<compile_context>
chip_gen: v7x
topology: tpu7x:2x2x1
jax: 0.10.0
libtpu: 0.0.40
codegen_flags: <defaults>
</compile_context>

<pallas_src>
import functools

import jax
import jax.numpy as jnp
from jax.experimental import pallas as pl
from jax.experimental.pallas import tpu as pltpu


def _round_up(x, m):
    return ((x + m - 1) // m) * m


def _dct_kernel(x_ref, w_ref, b_ref, o_ref):
    # x_ref: (C_in, t_hw)   w_ref: (4*C_out, C_in)   b_ref: (4*C_out, 1) f32
    # o_ref: (4*C_out, t_hw)
    y = jnp.dot(w_ref[...], x_ref[...], preferred_element_type=jnp.float32)
    y = y + b_ref[...]                       # bias broadcast along lanes, f32
    o_ref[...] = jnp.tanh(y).astype(o_ref.dtype)   # epilogue stays f32 (v5e-safe)


def _dct_matmul_tanh(x_r, w_flat, b_col, *, t_hw, out_dtype):
    N, C_in, HW_pad = x_r.shape
    ncols = w_flat.shape[0]                  # 4 * C_out
    grid = (N, HW_pad // t_hw)

    cost = pl.CostEstimate(
        flops=2 * N * HW_pad * C_in * ncols,
        transcendentals=N * HW_pad * ncols,
        bytes_accessed=(x_r.size * x_r.dtype.itemsize
                        + w_flat.size * w_flat.dtype.itemsize
                        + b_col.size * b_col.dtype.itemsize
                        + N * ncols * HW_pad * jnp.dtype(out_dtype).itemsize),
    )

    return pl.pallas_call(
        _dct_kernel,
        out_shape=jax.ShapeDtypeStruct((N, ncols, HW_pad), out_dtype),
        grid_spec=pltpu.PrefetchScalarGridSpec(
            num_scalar_prefetch=0,
            grid=grid,
            in_specs=[
                # squeeze the batch dim; pixel axis is lane-dense (t_hw % 128 == 0)
                pl.BlockSpec((None, C_in, t_hw), lambda n, i: (n, 0, i)),
                pl.BlockSpec((ncols, C_in), lambda n, i: (0, 0)),
                pl.BlockSpec((ncols, 1), lambda n, i: (0, 0)),
            ],
            out_specs=pl.BlockSpec((None, ncols, t_hw), lambda n, i: (n, 0, i)),
        ),
        compiler_params=pltpu.CompilerParams(
            dimension_semantics=("parallel", "parallel"),
            vmem_limit_bytes=32 * 1024 * 1024,   # safe on v5e/v6e/v7x
        ),
        cost_estimate=cost,
    )(x_r, w_flat, b_col)


def dct_forward(x_nchw, weight, bias, out_pad=0, compute_dtype=None):
    """Pallas DCT: ConvTranspose2d(k=2, s=2, output_padding=out_pad) + tanh.

    x_nchw : (N, C_in, H, W)
    weight : (C_in, C_out, 2, 2)   (PyTorch ConvTranspose2d weight layout)
    bias   : (C_out,)
    compute_dtype : optionally narrow HBM-resident x / weight (e.g. bf16 on
                    v6e/v7x); accumulation, bias add and tanh stay in f32.
    returns: (N, C_out, 2H + out_pad, 2W + out_pad)
    """
    N, C_in, H, W = x_nchw.shape
    cw_in, C_out, KH, KW = weight.shape
    assert (KH, KW) == (2, 2) and cw_in == C_in

    out_dtype = x_nchw.dtype
    HW = H * W

    # Lane-dense tile along the pixel axis; pad HW up so the grid always has
    # fixed-size, pipelined blocks (never a single whole-array block).
    t_hw = min(512, _round_up(HW, 128))
    HW_pad = _round_up(HW, t_hw)

    # (N, C_in, H, W) -> (N, C_in, H*W): a pure reshape, no transpose pass.
    x_r = x_nchw.reshape(N, C_in, HW)
    if HW_pad != HW:
        x_r = jnp.pad(x_r, ((0, 0), (0, 0), (0, HW_pad - HW)))

    # (C_in, C_out, 2, 2) -> (2, 2, C_out, C_in) -> (4*C_out, C_in); row=(kh,kw,co)
    w_flat = jnp.transpose(weight, (2, 3, 1, 0)).reshape(4 * C_out, C_in)
    b_col = jnp.tile(bias.astype(jnp.float32), 4).reshape(4 * C_out, 1)

    if compute_dtype is not None:
        x_r = x_r.astype(compute_dtype)
        w_flat = w_flat.astype(compute_dtype)

    y = _dct_matmul_tanh(x_r, w_flat, b_col, t_hw=t_hw, out_dtype=out_dtype)

    # (N, 4*C_out, HW_pad) -> drop pixel padding -> scatter (kh, kw) sub-pixels
    # back into NCHW.  (This is the single remaining wrapper transpose; the
    # module's contract is NCHW output so it cannot be elided here.)
    y = y[:, :, :HW].reshape(N, 2, 2, C_out, H, W)           # (n, kh, kw, co, h, w)
    out = jnp.transpose(y, (0, 3, 4, 1, 5, 2)).reshape(N, C_out, 2 * H, 2 * W)

    if out_pad:
        # output_padding rows/cols get no input taps -> value is tanh(bias).
        pad_val = jnp.tanh(bias.astype(jnp.float32)).astype(out_dtype)
        Ho, Wo = 2 * H, 2 * W
        col = jnp.broadcast_to(pad_val[None, :, None, None],
                               (N, C_out, Ho, out_pad))
        out = jnp.concatenate([out, col], axis=3)
        row = jnp.broadcast_to(pad_val[None, :, None, None],
                               (N, C_out, out_pad, Wo + out_pad))
        out = jnp.concatenate([out, row], axis=2)
    return out


def _reference(x_nchw, weight, bias):
    # Pure-JAX reference (ConvTranspose2d k=2 s=2 + tanh).
    N, C_in, H, W = x_nchw.shape
    _, C_out, _, _ = weight.shape
    y = jnp.einsum("nihw,iokl->nohkwl", x_nchw, weight)
    y = y.reshape(N, C_out, 2 * H, 2 * W) + bias[None, :, None, None]
    return jnp.tanh(y)


if __name__ == "__main__":
    key = jax.random.PRNGKey(0)
    k_x, k_w, k_b, k_x2 = jax.random.split(key, 4)

    N, C_in, C_out, H, W = 2, 4, 4, 16, 16
    x = jax.random.normal(k_x, (N, C_in, H, W), dtype=jnp.float32)

    bound = 1.0 / (C_in * 2 * 2) ** 0.5
    weight = jax.random.uniform(
        k_w, (C_in, C_out, 2, 2), minval=-bound, maxval=bound, dtype=jnp.float32
    )
    bias = jax.random.uniform(
        k_b, (C_out,), minval=-bound, maxval=bound, dtype=jnp.float32
    )

    # f32 path
    fwd = jax.jit(functools.partial(dct_forward, out_pad=0))
    out = jax.block_until_ready(fwd(x, weight, bias))
    ref = _reference(x, weight, bias)
    assert out.shape == (N, C_out, 2 * H, 2 * W), out.shape
    assert jnp.allclose(out, ref, atol=1e-5, rtol=1e-5)

    # Ragged pixel count (H*W not a multiple of 128) exercises the padding path.
    H2, W2 = 10, 13
    x2 = jax.random.normal(k_x2, (N, C_in, H2, W2), dtype=jnp.float32)
    out2 = jax.block_until_ready(jax.jit(dct_forward)(x2, weight, bias))
    ref2 = _reference(x2, weight, bias)
    assert out2.shape == (N, C_out, 2 * H2, 2 * W2), out2.shape
    assert jnp.allclose(out2, ref2, atol=1e-5, rtol=1e-5)

    # bf16-narrowed inputs (bandwidth saving on v6e/v7x); f32 accumulate/epilogue.
    fwd_bf16 = jax.jit(
        functools.partial(dct_forward, out_pad=0, compute_dtype=jnp.bfloat16)
    )
    out_bf = jax.block_until_ready(fwd_bf16(x, weight, bias))
    assert jnp.allclose(out_bf, ref, atol=5e-2, rtol=5e-2)

    print("KERNEL_OK")
</pallas_src>

<mosaic_0001>
module attributes {stable_mosaic.version = 11 : i64} {
  func.func @_dct_kernel(%arg0: i32, %arg1: i32, %arg2: memref<1x4x256xf32, #tpu.memory_space<vmem>>, %arg3: memref<16x4xf32, #tpu.memory_space<vmem>>, %arg4: memref<16x1xf32, #tpu.memory_space<vmem>>, %arg5: memref<1x16x256xf32, #tpu.memory_space<vmem>>) attributes {dimension_semantics = [#tpu.dimension_semantics<parallel>, #tpu.dimension_semantics<parallel>], iteration_bounds = array<i64: 2, 1>, scalar_prefetch = 0 : i64, scratch_operands = 0 : i64, tpu.core_type = #tpu.core_type<tc>, window_params = [{transform_indices = @transform_0, window_bounds = array<i64: 1, 4, 256>}, {pipeline_mode = #tpu.pipeline_mode<synchronous>, transform_indices = @transform_1, window_bounds = array<i64: 16, 4>}, {pipeline_mode = #tpu.pipeline_mode<synchronous>, transform_indices = @transform_2, window_bounds = array<i64: 16, 1>}, {transform_indices = @transform_3, window_bounds = array<i64: 1, 16, 256>}]} {
    %c0 = arith.constant 0 : index
    %c0_0 = arith.constant 0 : index
    %0 = vector.load %arg3[%c0, %c0_0] : memref<16x4xf32, #tpu.memory_space<vmem>>, vector<16x4xf32>
    %c0_1 = arith.constant 0 : index
    %c0_2 = arith.constant 0 : index
    %c0_3 = arith.constant 0 : index
    %1 = vector.load %arg2[%c0_1, %c0_2, %c0_3] : memref<1x4x256xf32, #tpu.memory_space<vmem>>, vector<1x4x256xf32>
    %2 = vector.shape_cast %1 : vector<1x4x256xf32> to vector<4x256xf32>
    %cst = arith.constant dense<0.000000e+00> : vector<16x256xf32>
    %3 = tpu.matmul %0, %2, %cst {dimension_numbers = #tpu.dot_dimension_numbers<[1], [0], [0], [1], [0, 0, 1, 1], [], []>} : vector<16x4xf32>, vector<4x256xf32>, vector<16x256xf32> -> vector<16x256xf32>
    %c0_4 = arith.constant 0 : index
    %c0_5 = arith.constant 0 : index
    %4 = vector.load %arg4[%c0_4, %c0_5] : memref<16x1xf32, #tpu.memory_space<vmem>>, vector<16x1xf32>
    %5 = vector.broadcast %4 : vector<16x1xf32> to vector<16x256xf32>
    %6 = arith.addf %3, %5 : vector<16x256xf32>
    %7 = math.tanh %6 : vector<16x256xf32>
    %c0_6 = arith.constant 0 : index
    %c0_7 = arith.constant 0 : index
    %c0_8 = arith.constant 0 : index
    %8 = vector.load %arg5[%c0_6, %c0_7, %c0_8] : memref<1x16x256xf32, #tpu.memory_space<vmem>>, vector<1x16x256xf32>
    %9 = vector.shape_cast %8 : vector<1x16x256xf32> to vector<16x256xf32>
    %10 = vector.shape_cast %7 : vector<16x256xf32> to vector<1x16x256xf32>
    tpu.vector_store %arg5[%c0_6, %c0_7, %c0_8], %10 {strides = array<i32>} : memref<1x16x256xf32, #tpu.memory_space<vmem>>, vector<1x16x256xf32>,
    return
  }
  func.func @transform_0(%arg0: i32, %arg1: i32) -> (i32, i32, i32) {
    %c0_i32 = arith.constant 0 : i32
    %c0_i32_0 = arith.constant 0 : i32
    return %arg0, %c0_i32, %arg1 : i32, i32, i32
  }
  func.func @transform_1(%arg0: i32, %arg1: i32) -> (i32, i32) {
    %c0_i32 = arith.constant 0 : i32
    %c0_i32_0 = arith.constant 0 : i32
    %c0_i32_1 = arith.constant 0 : i32
    return %c0_i32, %c0_i32_0 : i32, i32
  }
  func.func @transform_2(%arg0: i32, %arg1: i32) -> (i32, i32) {
    %c0_i32 = arith.constant 0 : i32
    %c0_i32_0 = arith.constant 0 : i32
    %c0_i32_1 = arith.constant 0 : i32
    return %c0_i32, %c0_i32_0 : i32, i32
  }
  func.func @transform_3(%arg0: i32, %arg1: i32) -> (i32, i32, i32) {
    %c0_i32 = arith.constant 0 : i32
    %c0_i32_0 = arith.constant 0 : i32
    return %arg0, %c0_i32, %arg1 : i32, i32, i32
  }
}

</mosaic_0001>

<bundles_post_ra>
// kernel: tile.0
= control target key start
LH: loop header
LB: loop body
LE: loop exit
PB: predicated region body
PF: predicated region fallthrough
CT: control target
= control target key end

     0   :  { %s34_s8 = smov 125   ;;  %vm7_vm0 = vcmask 7168   ;;  %s35_s11 = smov 126   ;;  %s61_s0 = inlined_call_operand.vmem [shape: f32[4,4], index: 0, kind: input, shape index: {}]   ;;  %s62_s1 = inlined_call_operand.vmem [shape: f32[16,1], index: 1, kind: output, shape index: {}]  }
   0x1   :  { %v4_v0 = vld [vmem:[%s61_s0] sm:$0xf]  ;;  %s33_s0 = smov 127  }
   0x2   :  { %5 = vst [vmem:[#allocation0] sm:$0xf] %v4_v0 }
   0x9   :  { %v9_v1 = vld [vmem:[#allocation0] sm:$0xf]  }
   0xa   :  { %v21_v2 = vld [vmem:[#allocation0] sm:$0xf]   ;;  %10 = vrot.lane.b32.xlu0 %v9_v1, %s33_s0 }
   0xb   :  { %22 = vrot.lane.b32.xlu1 %v21_v2, %s34_s8  ;;  %v6_v3 = vld [vmem:[#allocation0] sm:$0xf]  }
   0xc   :  { %v15_v4 = vld [vmem:[#allocation0] sm:$0xf]   ;;  %8 = vst.msk [vmem:[%s62_s1] ss:$4 sm:$0xf] %vm7_vm0, %v6_v3  }
   0xe   :  { %16 = vrot.lane.b32.xlu0 %v15_v4, %s35_s11 }
  0x7c   :  { %v11_v5 = vpop.permute.xlu0 %10  }
  0x7d   :  { %v23_v6 = vpop.permute.xlu1 %22   ;;  %27 = vst.msk [vmem:[%s62_s1 + $0x1] ss:$4 sm:$0xf] %vm7_vm0, %v11_v5  }
  0x7e   :  { %29 = vst.msk [vmem:[%s62_s1 + $0x3] ss:$4 sm:$0xf] %vm7_vm0, %v23_v6  }
  0x80   :  { %v17_v7 = vpop.permute.xlu0 %16  }
  0x81   :  { %28 = vst.msk [vmem:[%s62_s1 + $0x2] ss:$4 sm:$0xf] %vm7_vm0, %v17_v7  }

// kernel: tile.8
= control target key start
LH: loop header
LB: loop body
LE: loop exit
PB: predicated region body
PF: predicated region fallthrough
CT: control target
= control target key end

     0   :  { %s22_s0 = inlined_call_operand.vmem [shape: f32[4], index: 0, kind: input, shape index: {}]   ;;  %s23_s1 = inlined_call_operand.vmem [shape: f32[4,4], index: 1, kind: output, shape index: {}]  }
   0x1   :  { %v4_v0 = vld [vmem:[%s22_s0] ss:$0 sm:$0xff] }
   0x2   :  { %5 = vst [vmem:[%s23_s1] sm:$0xf] %v4_v0 }

// kernel: dct_forward.1
= control target key start
LH: loop header
LB: loop body
LE: loop exit
PB: predicated region body
PF: predicated region fallthrough
CT: control target
= control target key end

     0   :  { %s512_s12 = smov 0   ;;  %s514_s13 = smov 0   ;;  %s561_s0 = inlined_call_operand.vmem [shape: f32[2,4,256], index: 0, kind: input, shape index: {}]   ;;  %s562_s1 = inlined_call_operand.vmem [shape: f32[16,4], index: 1, kind: input, shape index: {}]   ;;  %s563_s2 = inlined_call_operand.vmem [shape: f32[16,1], index: 2, kind: input, shape index: {}]   ;;  %s564_s3 = inlined_call_operand.vmem [shape: f32[2,16,256], index: 3, kind: output, shape index: {}]  }
   0x1   :  { %s516_s14 = smov 0  }
   0x2 LB: > { %s25_s15 = sadd.s32 1, %s484_s13  ;;  %p415_p0 = scmp.ge.s32.totalorder %s488_s14, 1  ;;  %s488_s14 = sphi %s516_s14, %s13_s14   ;;  %s484_s13 = sphi %s514_s13, %s566_s13   ;;  %s480_s12 = sphi %s512_s12, %s565_s12  }
   0x3   : > { %p27_p1 = scmp.ge.s32.totalorder %s25_s15, 2  ;;  %p158_p2 = scmp.lt.s32.totalorder %s488_s14, 3 }
   0x5   : > { %s568_s15 = smov (%p27_p1, %s25_s15), 0  ;;  %p159_p3 = pnand %p415_p0, %p158_p2 }
   0x6   : > { %p191_p4 = scmp.lt.s32.totalorder (!%p159_p3), %s480_s12, 1  ;;  %v490_v0 = vmov (!%p159_p3), 0.0   ;;  %v213_v1 = vld [vmem:[%s563_s2] sm:$0xff] (!%p159_p3)  ;;  %v491_v2 = vmov (!%p159_p3), 0   ;;  %v214_v3 = vld [vmem:[%s563_s2 + $0x8] sm:$0xff] (!%p159_p3)  ;;  %vm234_vm0 = vcmask (!%p159_p3), 1043456  }
   0x7   : > { %162 = sbr.rel (%p159_p3) target bundleno = 251 (0xfb), region = 32  ;;  %303 = vmatprep.mubr.f32.mxu0 (!%p159_p3), %v490_v0  ;;  %309 = vmatprep.mubr.f32.mxu1 (!%p159_p3), %v490_v0  ;;  %v210_v6 = vld [vmem:[%s562_s1] sm:$0xff] (!%p159_p3)  ;;  %vm227_vm1 = vcmask (!%p159_p3), 31744   ;;  %v211_v7 = vld [vmem:[%s562_s1 + $0x8] sm:$0xff] (!%p159_p3) }
   0x8   : > { %456 = vset.pattern.permute.xlu0 (!%p159_p3), %v491_v2 }
   0x9   : > { %217 = vperm.xlu0 (!%p159_p3), %456, %v213_v1  }
   0xd   : > { %222 = vperm.xlu0 (!%p159_p3), %456, %v214_v3  }
   0xe   : > { %s570_s12 = smov (!%p191_p4, %s480_s12), 1 }
   0xf   : > { %s426_s18 = sshll.u32 %s570_s12, 3  ;;  %s427_s28 = sshll.u32 %s570_s12, 5 }
  0x10   : > { %s198_s23 = scalar_lea.vmem %s561_s0, %s426_s18  ;;  %s208_s4 = scalar_lea.vmem %s564_s3, %s427_s28 }
  0x11   : > { %v212_v4 = vld [vmem:[%s198_s23] sm:$0xff] }
  0x12   : > { %v226_v5 = vcombine.high %v212_v4, %v212_v4 }
  0x14   : > { %420 = vmatprep.subr.msk.mxu0 %vm234_vm0, %v226_v5  ;;  %428 = vmatprep.subr.msk.mxu1 %vm234_vm0, %v226_v5 }
  0x15   : > { %421 = vmatpush1.msk.msra.mxu0 %vm234_vm0, %v212_v4  ;;  %429 = vmatpush1.msk.msra.mxu1 %vm234_vm0, %v212_v4 }
  0x16   : > { %422 = vmatmul.mubr.msk.f32.vlgmr.msra.gmra.mrb[0].mxu0 %vm227_vm1, %v210_v6  ;;  %423 = vmatmul.mubr.msk.f32.vlgmr.msra.gmra.mrb[0].mxu1 %vm227_vm1, %v211_v7 }
  0x88   : > { %v218_v8 = vpop.permute.xlu0 %217 }
  0x8c   : > { %v223_v9 = vpop.permute.xlu0 %222 }
  0xe9   : > { %v305_v10 = vpop.f32.mrb[0].mxu0  ;;  %v311_v11 = vpop.f32.mrb[0].mxu1 }
  0xea   : > { %v306_v12 = vadd.f32 %v305_v10, %v218_v8  ;;  %v312_v13 = vadd.f32 %v311_v11, %v223_v9  ;;  %v307_v14 = vpop.f32.mrb[1].mxu0  ;;  %v313_v15 = vpop.f32.mrb[1].mxu1 }
  0xeb   : > { %v308_v16 = vadd.f32 %v307_v14, %v218_v8  ;;  %v314_v17 = vadd.f32 %v313_v15, %v223_v9 }
  0xec   : > { %458 = vtanh.f32 %v306_v12 }
  0xed   : > { %460 = vtanh.f32 %v312_v13 }
  0xee   : > { %462 = vtanh.f32 %v308_v16 }
  0xef   : > { %464 = vtanh.f32 %v314_v17 }
  0xf6   : > { %v459_v18 = vpop.eup %458 }
  0xf7   : > { %v461_v19 = vpop.eup %460  ;;  %320 = vst [vmem:[%s208_s4] sm:$0xff] %v459_v18 }
  0xf8   : > { %v463_v20 = vpop.eup %462  ;;  %322 = vst [vmem:[%s208_s4 + $0x10] sm:$0xff] %v461_v19 }
  0xf9   : > { %v465_v21 = vpop.eup %464  ;;  %321 = vst [vmem:[%s208_s4 + $0x8] sm:$0xff] %v463_v20 }
  0xfa   : > { %323 = vst [vmem:[%s208_s4 + $0x18] sm:$0xff] %v465_v21 }
  0xfb PF: > { %s13_s14 = sadd.s32 1, %s488_s14   ;;  %s565_s12 = smov %s484_s13 }
  0xfc   : > { %p10_p5 = scmp.ge.s32.totalorder %s13_s14, 4   ;;  %s566_s13 = smov %s568_s15 }
  0xfe   :  { %12 = sbr.rel (!%p10_p5) target bundleno = 2 (0x2), region = 62 }

</bundles_post_ra>
